<compile_context>
chip_gen: v6e
topology: v6e:2x2x1
jax: 0.10.0
libtpu: 0.0.40
codegen_flags: <defaults>
</compile_context>

<pallas_src>
import functools

import jax
import jax.numpy as jnp
from jax.experimental import pallas as pl
from jax.experimental.pallas import tpu as pltpu

_LANE = 128
_SUBLANE = 8
_MAX_TILE_B = 2048  # sized against v7x's 64 MiB VMEM; plenty for v5e/v6e too


def _round_up(n, m):
    return (n + m - 1) // m * m


def _ffn_kernel(x_ref, w1_ref, ln_ref, w2_ref, b2_ref, o_ref, *, hidden_dim):
    # ---- Linear 1 on the MXU: bf16 operands, f32 accumulation ----
    h = jnp.dot(x_ref[...], w1_ref[...], preferred_element_type=jnp.float32)

    b1 = ln_ref[0:1, :]      # (1, H) f32
    gamma = ln_ref[1:2, :]   # (1, H) f32
    beta = ln_ref[2:3, :]    # (1, H) f32
    h = h + b1

    # ---- LayerNorm (single pass: var = E[h^2] - mean^2), all f32 ----
    inv_h = jnp.float32(1.0 / hidden_dim)
    s1 = jnp.sum(h, axis=-1, keepdims=True)
    s2 = jnp.sum(h * h, axis=-1, keepdims=True)
    mean = s1 * inv_h
    var = s2 * inv_h - mean * mean
    hn = (h - mean) * jax.lax.rsqrt(var + 1e-5)
    hn = hn * gamma + beta

    # ---- ReLU ----
    hn = jnp.maximum(hn, 0.0)

    # ---- Dropout: identity (module evaluated in inference mode) ----
    # TODO(synk): training-mode dropout (p=0.5) via pltpu.prng_seed/prng_random_bits.

    # ---- Linear 2: bf16 on MXU, f32 accumulation; lane-dense padded output ----
    out = jnp.dot(hn.astype(jnp.bfloat16), w2_ref[...],
                  preferred_element_type=jnp.float32)
    o_ref[...] = out + b2_ref[...]


def cell_line_gene_ffn(x, w1, b1, gamma, beta, w2, b2):
    """x: (B, max_genes, input_dim) f32 -> (B, output_dim) f32 (eval-mode FFN).

    w1: (F, H), b1/gamma/beta: (H,), w2: (H, O), b2: (O,).
    """
    B = x.shape[0]
    x_flat = x.reshape(B, -1)                      # glue reshape in plain JAX
    F_dim = x_flat.shape[1]
    H = w1.shape[1]
    O = w2.shape[1]

    # MXU/lane-friendly padding of the contraction and output dims.
    F_pad = _round_up(F_dim, 256)
    O_pad = _round_up(O, _LANE)

    # Batch tile: big enough to amortize per-step overhead, capped for VMEM.
    tile_b = min(_MAX_TILE_B, _round_up(B, _SUBLANE))
    B_pad = _round_up(B, tile_b)

    # Pad + cast the MXU operands to bf16 (f32 accumulation inside the kernel).
    x_p = jnp.zeros((B_pad, F_pad), jnp.bfloat16).at[:B, :F_dim].set(
        x_flat.astype(jnp.bfloat16))
    w1_p = jnp.zeros((F_pad, H), jnp.bfloat16).at[:F_dim, :].set(
        w1.astype(jnp.bfloat16))
    w2_p = jnp.zeros((H, O_pad), jnp.bfloat16).at[:, :O].set(
        w2.astype(jnp.bfloat16))
    b2_p = jnp.zeros((1, O_pad), jnp.float32).at[:, :O].set(
        b2.reshape(1, O).astype(jnp.float32))
    # b1 / gamma / beta merged into a single (3, H) f32 operand.
    ln_p = jnp.stack(
        [b1.reshape(H), gamma.reshape(H), beta.reshape(H)]).astype(jnp.float32)

    vmem = pltpu.MemorySpace.VMEM
    kernel = functools.partial(_ffn_kernel, hidden_dim=H)

    out_p = pl.pallas_call(
        kernel,
        out_shape=jax.ShapeDtypeStruct((B_pad, O_pad), jnp.float32),
        grid=(B_pad // tile_b,),
        in_specs=[
            # x tile marches over the batch; everything else stays resident.
            pl.BlockSpec((tile_b, F_pad), lambda i: (i, 0), memory_space=vmem),
            pl.BlockSpec((F_pad, H), lambda i: (0, 0), memory_space=vmem),
            pl.BlockSpec((3, H), lambda i: (0, 0), memory_space=vmem),
            pl.BlockSpec((H, O_pad), lambda i: (0, 0), memory_space=vmem),
            pl.BlockSpec((1, O_pad), lambda i: (0, 0), memory_space=vmem),
        ],
        out_specs=pl.BlockSpec((tile_b, O_pad), lambda i: (i, 0),
                               memory_space=vmem),
        compiler_params=pltpu.CompilerParams(
            dimension_semantics=("parallel",),
            vmem_limit_bytes=64 << 20,
        ),
    )(x_p, w1_p, ln_p, w2_p, b2_p)

    return out_p[:B, :O]


def init_params(key, max_genes, input_dim, hidden_dim, output_dim):
    """Deterministic synthetic parameter init (shapes match nn.Linear/nn.LayerNorm)."""
    F_dim = max_genes * input_dim
    k1, k2, k3, k4 = jax.random.split(key, 4)
    w1 = jax.random.normal(k1, (F_dim, hidden_dim), jnp.float32) / jnp.sqrt(F_dim)
    b1 = jax.random.normal(k2, (hidden_dim,), jnp.float32) * 0.01
    gamma = jnp.ones((hidden_dim,), jnp.float32)
    beta = jnp.zeros((hidden_dim,), jnp.float32)
    w2 = jax.random.normal(k3, (hidden_dim, output_dim), jnp.float32) / jnp.sqrt(hidden_dim)
    b2 = jax.random.normal(k4, (output_dim,), jnp.float32) * 0.01
    return w1, b1, gamma, beta, w2, b2


def _reference(x, w1, b1, gamma, beta, w2, b2):
    """Mirrors the kernel math (bf16 MXU operands, f32 everything else)."""
    B = x.shape[0]
    xf = x.reshape(B, -1)
    h = jnp.dot(xf.astype(jnp.bfloat16), w1.astype(jnp.bfloat16),
                preferred_element_type=jnp.float32) + b1.reshape(1, -1)
    mean = h.mean(-1, keepdims=True)
    var = ((h - mean) ** 2).mean(-1, keepdims=True)
    hn = (h - mean) * jax.lax.rsqrt(var + 1e-5)
    hn = hn * gamma.reshape(1, -1) + beta.reshape(1, -1)
    hn = jnp.maximum(hn, 0.0)
    return jnp.dot(hn.astype(jnp.bfloat16), w2.astype(jnp.bfloat16),
                   preferred_element_type=jnp.float32) + b2.reshape(1, -1)


if __name__ == "__main__":
    # Small shapes consistent with the module: B=2, max_genes=16, input_dim=10.
    B, MAX_GENES, INPUT_DIM = 2, 16, 10
    HIDDEN_DIM, OUTPUT_DIM = 256, 32

    key = jax.random.PRNGKey(0)
    kx, kp = jax.random.split(key)
    x = jax.random.normal(kx, (B, MAX_GENES, INPUT_DIM), jnp.float32)
    params = init_params(kp, MAX_GENES, INPUT_DIM, HIDDEN_DIM, OUTPUT_DIM)

    out = jax.block_until_ready(cell_line_gene_ffn(x, *params))
    ref = _reference(x, *params)

    assert out.shape == (B, OUTPUT_DIM), out.shape
    max_err = float(jnp.max(jnp.abs(out - ref)))
    assert jnp.allclose(out, ref, atol=5e-3, rtol=5e-3), max_err

    print("KERNEL_OK")
</pallas_src>

<mosaic_0001>
module attributes {stable_mosaic.version = 11 : i64} {
  func.func @_ffn_kernel(%arg0: i32, %arg1: memref<8x256xbf16, #tpu.memory_space<vmem>>, %arg2: memref<256x256xbf16, #tpu.memory_space<vmem>>, %arg3: memref<3x256xf32, #tpu.memory_space<vmem>>, %arg4: memref<256x128xbf16, #tpu.memory_space<vmem>>, %arg5: memref<1x128xf32, #tpu.memory_space<vmem>>, %arg6: memref<8x128xf32, #tpu.memory_space<vmem>>) attributes {dimension_semantics = [#tpu.dimension_semantics<parallel>], iteration_bounds = array<i64: 1>, scalar_prefetch = 0 : i64, scratch_operands = 0 : i64, tpu.core_type = #tpu.core_type<tc>, window_params = [{transform_indices = @transform_0, window_bounds = array<i64: 8, 256>}, {pipeline_mode = #tpu.pipeline_mode<synchronous>, transform_indices = @transform_1, window_bounds = array<i64: 256, 256>}, {pipeline_mode = #tpu.pipeline_mode<synchronous>, transform_indices = @transform_2, window_bounds = array<i64: 3, 256>}, {pipeline_mode = #tpu.pipeline_mode<synchronous>, transform_indices = @transform_3, window_bounds = array<i64: 256, 128>}, {pipeline_mode = #tpu.pipeline_mode<synchronous>, transform_indices = @transform_4, window_bounds = array<i64: 1, 128>}, {transform_indices = @transform_5, window_bounds = array<i64: 8, 128>}]} {
    %c0 = arith.constant 0 : index
    %c0_0 = arith.constant 0 : index
    %0 = vector.load %arg1[%c0, %c0_0] : memref<8x256xbf16, #tpu.memory_space<vmem>>, vector<8x256xbf16>
    %c0_1 = arith.constant 0 : index
    %c0_2 = arith.constant 0 : index
    %1 = vector.load %arg2[%c0_1, %c0_2] : memref<256x256xbf16, #tpu.memory_space<vmem>>, vector<256x256xbf16>
    %cst = arith.constant dense<0.000000e+00> : vector<8x256xf32>
    %2 = tpu.matmul %0, %1, %cst {dimension_numbers = #tpu.dot_dimension_numbers<[1], [0], [0], [1], [0, 0, 1, 1], [], []>} : vector<8x256xbf16>, vector<256x256xbf16>, vector<8x256xf32> -> vector<8x256xf32>
    %c0_3 = arith.constant 0 : index
    %c0_4 = arith.constant 0 : index
    %3 = vector.load %arg3[%c0_3, %c0_4] : memref<3x256xf32, #tpu.memory_space<vmem>>, vector<1x256xf32>
    %c1 = arith.constant 1 : index
    %c0_5 = arith.constant 0 : index
    %4 = vector.load %arg3[%c1, %c0_5] : memref<3x256xf32, #tpu.memory_space<vmem>>, vector<1x256xf32>
    %c2 = arith.constant 2 : index
    %c0_6 = arith.constant 0 : index
    %5 = vector.load %arg3[%c2, %c0_6] : memref<3x256xf32, #tpu.memory_space<vmem>>, vector<1x256xf32>
    %6 = vector.broadcast %3 : vector<1x256xf32> to vector<8x256xf32>
    %7 = arith.addf %2, %6 : vector<8x256xf32>
    %cst_7 = arith.constant dense<0.000000e+00> : vector<8xf32>
    %8 = vector.multi_reduction <add>, %7, %cst_7 [1] : vector<8x256xf32> to vector<8xf32>
    %9 = vector.shape_cast %8 : vector<8xf32> to vector<8x1xf32>
    %10 = arith.mulf %7, %7 : vector<8x256xf32>
    %cst_8 = arith.constant dense<0.000000e+00> : vector<8xf32>
    %11 = vector.multi_reduction <add>, %10, %cst_8 [1] : vector<8x256xf32> to vector<8xf32>
    %12 = vector.shape_cast %11 : vector<8xf32> to vector<8x1xf32>
    %cst_9 = arith.constant 3.906250e-03 : f32
    %13 = vector.broadcast %cst_9 : f32 to vector<8x1xf32>
    %14 = arith.mulf %9, %13 : vector<8x1xf32>
    %cst_10 = arith.constant 3.906250e-03 : f32
    %15 = vector.broadcast %cst_10 : f32 to vector<8x1xf32>
    %16 = arith.mulf %12, %15 : vector<8x1xf32>
    %17 = arith.mulf %14, %14 : vector<8x1xf32>
    %18 = arith.subf %16, %17 : vector<8x1xf32>
    %19 = vector.broadcast %14 : vector<8x1xf32> to vector<8x256xf32>
    %20 = arith.subf %7, %19 : vector<8x256xf32>
    %cst_11 = arith.constant 9.99999974E-6 : f32
    %21 = vector.broadcast %cst_11 : f32 to vector<8x1xf32>
    %22 = arith.addf %18, %21 : vector<8x1xf32>
    %23 = math.rsqrt %22 : vector<8x1xf32>
    %24 = vector.broadcast %23 : vector<8x1xf32> to vector<8x256xf32>
    %25 = arith.mulf %20, %24 : vector<8x256xf32>
    %26 = vector.broadcast %4 : vector<1x256xf32> to vector<8x256xf32>
    %27 = arith.mulf %25, %26 : vector<8x256xf32>
    %28 = vector.broadcast %5 : vector<1x256xf32> to vector<8x256xf32>
    %29 = arith.addf %27, %28 : vector<8x256xf32>
    %cst_12 = arith.constant 0.000000e+00 : f32
    %30 = vector.broadcast %cst_12 : f32 to vector<8x256xf32>
    %31 = arith.maximumf %29, %30 : vector<8x256xf32>
    %32 = arith.truncf %31 : vector<8x256xf32> to vector<8x256xbf16>
    %c0_13 = arith.constant 0 : index
    %c0_14 = arith.constant 0 : index
    %33 = vector.load %arg4[%c0_13, %c0_14] : memref<256x128xbf16, #tpu.memory_space<vmem>>, vector<256x128xbf16>
    %cst_15 = arith.constant dense<0.000000e+00> : vector<8x128xf32>
    %34 = tpu.matmul %32, %33, %cst_15 {dimension_numbers = #tpu.dot_dimension_numbers<[1], [0], [0], [1], [0, 0, 1, 1], [], []>} : vector<8x256xbf16>, vector<256x128xbf16>, vector<8x128xf32> -> vector<8x128xf32>
    %c0_16 = arith.constant 0 : index
    %c0_17 = arith.constant 0 : index
    %35 = vector.load %arg5[%c0_16, %c0_17] : memref<1x128xf32, #tpu.memory_space<vmem>>, vector<1x128xf32>
    %36 = vector.broadcast %35 : vector<1x128xf32> to vector<8x128xf32>
    %37 = arith.addf %34, %36 : vector<8x128xf32>
    %c0_18 = arith.constant 0 : index
    %c0_19 = arith.constant 0 : index
    %38 = vector.load %arg6[%c0_18, %c0_19] : memref<8x128xf32, #tpu.memory_space<vmem>>, vector<8x128xf32>
    tpu.vector_store %arg6[%c0_18, %c0_19], %37 {strides = array<i32>} : memref<8x128xf32, #tpu.memory_space<vmem>>, vector<8x128xf32>,
    return
  }
  func.func @transform_0(%arg0: i32) -> (i32, i32) {
    %c0_i32 = arith.constant 0 : i32
    %c0_i32_0 = arith.constant 0 : i32
    return %arg0, %c0_i32 : i32, i32
  }
  func.func @transform_1(%arg0: i32) -> (i32, i32) {
    %c0_i32 = arith.constant 0 : i32
    %c0_i32_0 = arith.constant 0 : i32
    %c0_i32_1 = arith.constant 0 : i32
    return %c0_i32, %c0_i32_0 : i32, i32
  }
  func.func @transform_2(%arg0: i32) -> (i32, i32) {
    %c0_i32 = arith.constant 0 : i32
    %c0_i32_0 = arith.constant 0 : i32
    %c0_i32_1 = arith.constant 0 : i32
    return %c0_i32, %c0_i32_0 : i32, i32
  }
  func.func @transform_3(%arg0: i32) -> (i32, i32) {
    %c0_i32 = arith.constant 0 : i32
    %c0_i32_0 = arith.constant 0 : i32
    %c0_i32_1 = arith.constant 0 : i32
    return %c0_i32, %c0_i32_0 : i32, i32
  }
  func.func @transform_4(%arg0: i32) -> (i32, i32) {
    %c0_i32 = arith.constant 0 : i32
    %c0_i32_0 = arith.constant 0 : i32
    %c0_i32_1 = arith.constant 0 : i32
    return %c0_i32, %c0_i32_0 : i32, i32
  }
  func.func @transform_5(%arg0: i32) -> (i32, i32) {
    %c0_i32 = arith.constant 0 : i32
    %c0_i32_0 = arith.constant 0 : i32
    return %arg0, %c0_i32 : i32, i32
  }
}

</mosaic_0001>

<bundles_post_ra>
// kernel: tpu_custom_call.1
= control target key start
LH: loop header
LB: loop body
LE: loop exit
PB: predicated region body
PF: predicated region fallthrough
CT: control target
= control target key end

     0   :  { %10 = vsyncpa [#allocation3], 0  ;;  %s896_s0 = inlined_call_operand.hbm [shape: bf16[8,256], index: 0, kind: input, shape index: {}]   ;;  %s897_s1 = inlined_call_operand.hbm [shape: bf16[256,256], index: 1, kind: input, shape index: {}]   ;;  %s898_s2 = inlined_call_operand.hbm [shape: f32[3,256], index: 2, kind: input, shape index: {}]   ;;  %s899_s3 = inlined_call_operand.hbm [shape: bf16[256,128], index: 3, kind: input, shape index: {}]   ;;  %s900_s4 = inlined_call_operand.vmem [shape: f32[1,128], index: 4, kind: input, shape index: {}]   ;;  %s901_s5 = inlined_call_operand.hbm [shape: f32[8,128], index: 5, kind: output, shape index: {}]  }
   0x1   :  { %11 = vsyncpa [#allocation6], 0 }
   0x2   :  { %12 = vsyncpa [#allocation9], 0 }
   0x3   :  { %13 = vsyncpa [#allocation4], 0  ;;  %s829_s18 = smov [#allocation5]  }
   0x4   :  { %s29_s19 = sshll.u32 %s829_s18, 4  ;;  %s30_s19 = int_to_ptr.vmem [resolvable:$true] %s29_s19 }
   0x5   :  { %s729_s20 = scalar_lea.vmem %s30_s19, 4096  ;;  %p734_p1 = scmp.lt.s32.totalorder %s30_s19, %s30_s19 }
   0x6   :  { %p730_p0 = scmp.ne.s32.totalorder %s30_s19, %s729_s20  ;;  %p735_p2 = scmp.lt.s32.totalorder %s729_s20, %s729_s20 }
   0x8   :  { %p736_p3 = por %p735_p2, %p734_p1 }
   0xa   :  { %p737_p4 = pnand %p736_p3, %p730_p0 }
   0xc   :  { %740 = shalt.err (!%p737_p4)
}
   0xd   :  { %s830_s21 = smov 128   ;;  %s831_s22 = smov 8  }
   0xe   :  { %35 = dma.hbm_to_vmem [thread:$0]  %s897_s1, 4096, %s30_s19, [#allocation6], %s830_s21, %s830_s21, %s831_s22  }
   0xf   :  { %s832_s25 = smov [#allocation2]   ;;  %s833_s27 = smov [#allocation7]  }
  0x10   :  { %s20_s26 = sshll.u32 %s832_s25, 4  ;;  %s42_s28 = sshll.u32 %s833_s27, 4  ;;  %s21_s26 = int_to_ptr.vmem [resolvable:$true] %s20_s26  ;;  %s43_s28 = int_to_ptr.vmem [resolvable:$true] %s42_s28 }
  0x11   :  { %s749_s29 = scalar_lea.vmem %s21_s26, 128  ;;  %p754_p6 = scmp.lt.s32.totalorder %s21_s26, %s21_s26 }
  0x12   :  { %p750_p5 = scmp.ne.s32.totalorder %s21_s26, %s749_s29  ;;  %p755_p7 = scmp.lt.s32.totalorder %s749_s29, %s749_s29 }
  0x14   :  { %p756_p8 = por %p755_p7, %p754_p6 }
  0x16   :  { %p757_p9 = pnand %p756_p8, %p750_p5 }
  0x18   :  { %760 = shalt.err (!%p757_p9)
}
  0x19   :  { %23 = dma.hbm_to_vmem [thread:$0]  %s896_s0, 128, %s21_s26, [#allocation3]  }
  0x1a   :  { %s769_s7 = scalar_lea.vmem %s43_s28, 128  ;;  %p774_p11 = scmp.lt.s32.totalorder %s43_s28, %s43_s28 }
  0x1b   :  { %p770_p10 = scmp.ne.s32.totalorder %s43_s28, %s769_s7  ;;  %p775_p12 = scmp.lt.s32.totalorder %s769_s7, %s769_s7 }
  0x1d   :  { %p776_p13 = por %p775_p12, %p774_p11 }
  0x1f   :  { %p777_p0 = pnand %p776_p13, %p770_p10 }
  0x21   :  { %780 = shalt.err (!%p777_p0)
}
  0x22   :  { %45 = dma.hbm_to_vmem [thread:$0]  %s898_s2, 128, %s43_s28, [#allocation6]  }
  0x23   :  { %s834_s9 = smov [#allocation8]  }
  0x24   :  { %s51_s10 = sshll.u32 %s834_s9, 4  ;;  %s52_s10 = int_to_ptr.vmem [resolvable:$true] %s51_s10 }
  0x25   :  { %s789_s11 = scalar_lea.vmem %s52_s10, 2048  ;;  %p794_p2 = scmp.lt.s32.totalorder %s52_s10, %s52_s10 }
  0x26   :  { %p790_p1 = scmp.ne.s32.totalorder %s52_s10, %s789_s11  ;;  %p795_p3 = scmp.lt.s32.totalorder %s789_s11, %s789_s11 }
  0x28   :  { %p796_p4 = por %p795_p3, %p794_p2 }
  0x2a   :  { %p797_p5 = pnand %p796_p4, %p790_p1 }
  0x2c   :  { %800 = shalt.err (!%p797_p5)
}
  0x2d   :  { %s835_s0 = smov 64   ;;  %s836_s12 = smov 4  }
  0x2e   :  { %57 = dma.hbm_to_vmem [thread:$0]  %s899_s3, 2048, %s52_s10, [#allocation9], %s835_s0, %s835_s0, %s836_s12  }
  0x2f   :  { %821 = dma.done.wait [#allocation3], 128  }
  0x30   :  { %822 = vsyncadd [#allocation3], 4294967168 }
  0x31   :  { %823 = dma.done.wait [#allocation6], 4224  }
  0x32   :  { %824 = vsyncadd [#allocation6], 4294963072 }
  0x33   :  { %825 = dma.done.wait [#allocation9], 2048  }
  0x34   :  { %826 = vsyncadd [#allocation9], 4294965248  ;;  %v653_v0 = vld [vmem:[#allocation5 + $0x74] ss:$8 sps:$4 sm:$0xff]   ;;  %v655_v1 = vld [vmem:[#allocation5 + $0x70] ss:$8 sps:$4 sm:$0xff]   ;;  %v112_v35 = vlaneseq }
  0x35   :  { %289 = vmatprep.subr.bf16.mxu0 %v653_v0  ;;  %v656_v2 = vld [vmem:[#allocation5 + $0x64] ss:$8 sps:$4 sm:$0xff]   ;;  %v658_v3 = vld [vmem:[#allocation5 + $0x60] ss:$8 sps:$4 sm:$0xff]   ;;  %v659_v4 = vld [vmem:[#allocation5 + $0x54] ss:$8 sps:$4 sm:$0xff]  }
  0x36   :  { %290 = vmatpush1.bf16.msra.mxu0 %v655_v1  ;;  %v661_v5 = vld [vmem:[#allocation5 + $0x50] ss:$8 sps:$4 sm:$0xff]   ;;  %v662_v6 = vld [vmem:[#allocation5 + $0x44] ss:$8 sps:$4 sm:$0xff]   ;;  %v664_v7 = vld [vmem:[#allocation5 + $0x40] ss:$8 sps:$4 sm:$0xff]  }
  0x37   :  { %291 = vmatprep.subr.bf16.mxu0 %v656_v2  ;;  %v665_v8 = vld [vmem:[#allocation5 + $0x34] ss:$8 sps:$4 sm:$0xff]   ;;  %v667_v9 = vld [vmem:[#allocation5 + $0x30] ss:$8 sps:$4 sm:$0xff]   ;;  %v668_v10 = vld [vmem:[#allocation5 + $0x24] ss:$8 sps:$4 sm:$0xff]  }
  0x38   :  { %v670_v11 = vld [vmem:[#allocation5 + $0x20] ss:$8 sps:$4 sm:$0xff]   ;;  %v671_v12 = vld [vmem:[#allocation5 + $0x14] ss:$8 sps:$4 sm:$0xff]   ;;  %v673_v13 = vld [vmem:[#allocation5 + $0x10] ss:$8 sps:$4 sm:$0xff]  }
  0x39   :  { %v73_v14 = vld [vmem:[#allocation2] sm:$0xff]  ;;  %v674_v15 = vld [vmem:[#allocation5 + $0x4] ss:$8 sps:$4 sm:$0xff]   ;;  %v676_v17 = vld [vmem:[#allocation5] ss:$8 sps:$4 sm:$0xff]   ;;  %v113_v36 = vshrl.u32 %v112_v35, 7 }
  0x3a   :  { %292 = vmatpush1.bf16.msra.mxu0 %v658_v3  ;;  %v572_v16 = vcombine.high %v73_v14, %v73_v14  ;;  %v677_v18 = vld [vmem:[#allocation5 + $0xf4] ss:$8 sps:$4 sm:$0xff]   ;;  %v679_v19 = vld [vmem:[#allocation5 + $0xf0] ss:$8 sps:$4 sm:$0xff]   ;;  %v680_v20 = vld [vmem:[#allocation5 + $0xe4] ss:$8 sps:$4 sm:$0xff]   ;;  %v571_v34 = vcombine.low %v73_v14, %v73_v14 }
  0x3b   :  { %293 = vmatprep.subr.bf16.mxu0 %v659_v4  ;;  %v682_v21 = vld [vmem:[#allocation5 + $0xe0] ss:$8 sps:$4 sm:$0xff]   ;;  %v683_v22 = vld [vmem:[#allocation5 + $0xd4] ss:$8 sps:$4 sm:$0xff]   ;;  %v685_v23 = vld [vmem:[#allocation5 + $0xd0] ss:$8 sps:$4 sm:$0xff]  }
  0x3c   :  { %321 = vmatprep.mubr.bf16.mxu0 %v572_v16  ;;  %v686_v24 = vld [vmem:[#allocation5 + $0xc4] ss:$8 sps:$4 sm:$0xff]   ;;  %v688_v25 = vld [vmem:[#allocation5 + $0xc0] ss:$8 sps:$4 sm:$0xff]   ;;  %v689_v26 = vld [vmem:[#allocation5 + $0xb4] ss:$8 sps:$4 sm:$0xff]  }
  0x3d   :  { %v691_v27 = vld [vmem:[#allocation5 + $0xb0] ss:$8 sps:$4 sm:$0xff]   ;;  %v692_v28 = vld [vmem:[#allocation5 + $0xa4] ss:$8 sps:$4 sm:$0xff]   ;;  %v694_v29 = vld [vmem:[#allocation5 + $0xa0] ss:$8 sps:$4 sm:$0xff]  }
  0x3e   :  { %294 = vmatpush1.bf16.msra.mxu0 %v661_v5  ;;  %v695_v30 = vld [vmem:[#allocation5 + $0x94] ss:$8 sps:$4 sm:$0xff]   ;;  %v697_v31 = vld [vmem:[#allocation5 + $0x90] ss:$8 sps:$4 sm:$0xff]   ;;  %v698_v32 = vld [vmem:[#allocation5 + $0x84] ss:$8 sps:$4 sm:$0xff]  }
  0x3f   :  { %295 = vmatprep.subr.bf16.mxu0 %v662_v6  ;;  %v700_v33 = vld [vmem:[#allocation5 + $0x80] ss:$8 sps:$4 sm:$0xff]   ;;  %v880_v37 = vsub.s32 0, %v113_v36  ;;  %v882_v38 = vsub.s32 1, %v113_v36  ;;  %v705_v54 = vld [vmem:[#allocation8 + $0x70] sm:$0xff]   ;;  %v707_v56 = vld [vmem:[#allocation8 + $0x68] sm:$0xff]  }
  0x40   :  { %v106_v39 = vld [vmem:[#allocation7] ss:$4 sm:$0x3]  ;;  %v706_v55 = vld [vmem:[#allocation8 + $0x30] sm:$0xff]   ;;  %v708_v57 = vld [vmem:[#allocation8 + $0x28] sm:$0xff]   ;;  %s837_s15 = smov [#allocation10]  }
  0x41   :  { %v115_v40 = vrot.slane %v106_v39, %v880_v37  ;;  %v119_v41 = vrot.slane %v106_v39, %v882_v38  ;;  %v703_v52 = vld [vmem:[#allocation8 + $0x78] sm:$0xff]   ;;  %v709_v58 = vld [vmem:[#allocation8 + $0x60] sm:$0xff]   ;;  %v713_v62 = vld [vmem:[#allocation8 + $0x50] sm:$0xff]   ;;  %s560_s16 = sshll.u32 %s837_s15, 4  ;;  %s561_s16 = int_to_ptr.vmem [resolvable:$true] %s560_s16 }
  0x42   :  { %296 = vmatpush1.bf16.msra.mxu0 %v664_v7  ;;  %v704_v53 = vld [vmem:[#allocation8 + $0x38] sm:$0xff]   ;;  %622 = vmatprep.subr.bf16.mxu1 %v703_v52  ;;  %v710_v59 = vld [vmem:[#allocation8 + $0x20] sm:$0xff]   ;;  %v714_v63 = vld [vmem:[#allocation8 + $0x10] sm:$0xff]   ;;  %s801_s17 = scalar_lea.vmem %s561_s16, 128  ;;  %p806_p7 = scmp.lt.s32.totalorder %s561_s16, %s561_s16 }
  0x43   :  { %297 = vmatprep.subr.bf16.mxu0 %v665_v8  ;;  %623 = vmatpush3.bf16.msra.mxu1 %v704_v53  ;;  %v711_v60 = vld [vmem:[#allocation8 + $0x58] sm:$0xff]   ;;  %v715_v0 = vld [vmem:[#allocation8 + $0x48] sm:$0xff]   ;;  %v717_v2 = vld [vmem:[#allocation8 + $0x40] sm:$0xff]   ;;  %p802_p6 = scmp.ne.s32.totalorder %s561_s16, %s801_s17  ;;  %p807_p8 = scmp.lt.s32.totalorder %s801_s17, %s801_s17 }
  0x44   :  { %624 = vmatprep.subr.bf16.mxu1 %v705_v54  ;;  %v712_v61 = vld [vmem:[#allocation8 + $0x18] sm:$0xff]   ;;  %v716_v1 = vld [vmem:[#allocation8 + $0x8] sm:$0xff]   ;;  %v718_v3 = vld [vmem:[#allocation8] sm:$0xff]  }
  0x45   :  { %p808_p9 = por %p807_p8, %p806_p7 }
  0x46   :  { %298 = vmatpush1.bf16.msra.mxu0 %v667_v9 }
  0x47   :  { %299 = vmatprep.subr.bf16.mxu0 %v668_v10  ;;  %625 = vmatpush3.bf16.msra.mxu1 %v706_v55  ;;  %p809_p10 = pnand %p808_p9, %p802_p6 }
  0x48   :  { %626 = vmatprep.subr.bf16.mxu1 %v707_v56 }
  0x4a   :  { %300 = vmatpush1.bf16.msra.mxu0 %v670_v11  ;;  %v108_v11 = vld [vmem:[#allocation7 + $0x1] ss:$4 sm:$0x3] }
  0x4b   :  { %301 = vmatprep.subr.bf16.mxu0 %v671_v12  ;;  %627 = vmatpush3.bf16.msra.mxu1 %v708_v57  ;;  %v110_v12 = vld [vmem:[#allocation7 + $0x2] ss:$4 sm:$0x3]  ;;  %v356_v16 = vrot.slane %v108_v11, %v882_v38 }
  0x4c   :  { %628 = vmatprep.subr.bf16.mxu1 %v709_v58 }
  0x4e   :  { %302 = vmatpush1.bf16.msra.mxu0 %v673_v13 }
  0x4f   :  { %303 = vmatprep.subr.bf16.mxu0 %v674_v15  ;;  %629 = vmatpush3.bf16.msra.mxu1 %v710_v59  ;;  %v352_v15 = vrot.slane %v108_v11, %v880_v37 }
  0x50   :  { %630 = vmatprep.subr.bf16.mxu1 %v711_v60 }
  0x52   :  { %304 = vmatpush1.bf16.msra.mxu0 %v676_v17 }
  0x53   :  { %305 = vmatprep.subr.bf16.mxu0 %v677_v18  ;;  %631 = vmatpush3.bf16.msra.mxu1 %v712_v61 }
  0x54   :  { %632 = vmatprep.subr.bf16.mxu1 %v713_v62 }
  0x56   :  { %306 = vmatpush2.bf16.msra.mxu0 %v679_v19  ;;  %v365_v19 = vrot.slane %v110_v12, %v880_v37 }
  0x57   :  { %307 = vmatprep.subr.bf16.mxu0 %v680_v20  ;;  %633 = vmatpush3.bf16.msra.mxu1 %v714_v63  ;;  %v369_v20 = vrot.slane %v110_v12, %v882_v38 }
  0x58   :  { %634 = vmatprep.subr.bf16.mxu1 %v715_v0 }
  0x5a   :  { %308 = vmatpush2.bf16.msra.mxu0 %v682_v21 }
  0x5b   :  { %309 = vmatprep.subr.bf16.mxu0 %v683_v22  ;;  %635 = vmatpush3.bf16.msra.mxu1 %v716_v1 }
  0x5c   :  { %636 = vmatprep.subr.bf16.mxu1 %v717_v2 }
  0x5e   :  { %310 = vmatpush2.bf16.msra.mxu0 %v685_v23 }
  0x5f   :  { %311 = vmatprep.subr.bf16.mxu0 %v686_v24  ;;  %637 = vmatpush3.bf16.msra.mxu1 %v718_v3 }
  0x62   :  { %312 = vmatpush2.bf16.msra.mxu0 %v688_v25 }
  0x63   :  { %313 = vmatprep.subr.bf16.mxu0 %v689_v26 }
  0x66   :  { %314 = vmatpush2.bf16.msra.mxu0 %v691_v27 }
  0x67   :  { %315 = vmatprep.subr.bf16.mxu0 %v692_v28 }
  0x6a   :  { %316 = vmatpush2.bf16.msra.mxu0 %v694_v29 }
  0x6b   :  { %317 = vmatprep.subr.bf16.mxu0 %v695_v30 }
  0x6e   :  { %318 = vmatpush2.bf16.msra.mxu0 %v697_v31  ;;  %v605_v31 = vld [vmem:[%s900_s4] ss:$0 sm:$0xff] }
  0x6f   :  { %319 = vmatprep.subr.bf16.mxu0 %v698_v32 }
  0x72   :  { %320 = vmatpush2.bf16.msra.mxu0 %v700_v33 }
  0x75   :  { %322 = vmatmul.mubr.bf16.vlgmr.msra.gmra.mxu0 %v571_v34 }
 0x135   :  { %v323_v42 = vpop.f32.mrf.mxu0 }
 0x136   :  { %v324_v44 = vadd.f32 %v323_v42, %v115_v40 }
 0x137   :  { %v325_v43 = vpop.f32.mrf.mxu0 }
 0x138   :  { %v326_v45 = vadd.f32 %v325_v43, %v119_v41  ;;  %v333_v50 = vmul.f32 %v324_v44, %v324_v44 }
 0x139   :  { %v327_v46 = vpop.f32.mrf.mxu0 }
 0x13a   :  { %v330_v47 = vadd.f32 %v326_v45, %v324_v44  ;;  %v334_v48 = vmul.f32 %v326_v45, %v326_v45 }
 0x13b   :  { %v328_v49 = vpop.f32.mrf.mxu0 }
 0x13c   :  { %331 = vadd.xlane.f32.xlu0 %v330_v47  ;;  %v335_v51 = vadd.f32 %v334_v48, %v333_v50 }
 0x140   :  { %336 = vadd.xlane.f32.xlu0 %v335_v51 }
 0x1c5   :  { %v332_v4 = vpop.xlane.xlu0 %331 }
 0x1c6   :  { %v338_v5 = vmul.f32 0.00390625, %v332_v4 }
 0x1c8   :  { %v340_v7 = vmul.f32 %v338_v5, %v338_v5  ;;  %v342_v13 = vsub.f32 %v324_v44, %v338_v5  ;;  %v343_v14 = vsub.f32 %v326_v45, %v338_v5 }
 0x1c9   :  { %v337_v6 = vpop.xlane.xlu0 %336 }
 0x1ca   :  { %v339_v8 = vmul.f32 0.00390625, %v337_v6 }
 0x1cc   :  { %v341_v9 = vsub.f32 %v339_v8, %v340_v7 }
 0x1ce   :  { %v344_v10 = vadd.f32 1e-05, %v341_v9 }
 0x1d0   :  { %719 = vrsqrt.f32 %v344_v10 }
 0x1dd   :  { %v720_v17 = vpop.eup %719 }
 0x1de   :  { %v347_v18 = vmul.f32 %v720_v17, %v343_v14  ;;  %v346_v21 = vmul.f32 %v720_v17, %v342_v13 }
 0x1e0   :  { %v360_v22 = vmul.f32 %v356_v16, %v347_v18  ;;  %v359_v23 = vmul.f32 %v352_v15, %v346_v21 }
 0x1e2   :  { %v373_v24 = vadd.f32 %v369_v20, %v360_v22  ;;  %v372_v25 = vadd.f32 %v365_v19, %v359_v23 }
 0x1e4   :  { %v375_v26 = vmax.f32 %v373_v24, 0.0  ;;  %v374_v27 = vmax.f32 %v372_v25, 0.0 }
 0x1e6   :  { %v377_v28 = vpack.c.bf16 %v375_v26, %v375_v26  ;;  %v376_v29 = vpack.c.bf16 %v374_v27, %v374_v27 }
 0x1e8   :  { %545 = vmatprep.mubr.bf16.mxu1 %v377_v28 }
 0x1e9   :  { %546 = vmatmul.mubr.bf16.vlgmr.msra.gmra.mxu1 %v376_v29 }
 0x2a9   :  { %v638_v30 = vpop.f32.mrf.mxu1 }
 0x2ab   :  { %v639_v32 = vpop.f32.mrf.mxu1 }
 0x2ac   :  { %v640_v33 = vadd.f32 %v639_v32, %v638_v30 }
 0x2ad   :  { %v641_v34 = vpop.f32.mrf.mxu1 }
 0x2ae   :  { %v548_v35 = vadd.f32 %v640_v33, %v605_v31 }
 0x2af   :  { %v642_v36 = vpop.f32.mrf.mxu1 }
 0x2b0   :  { %553 = vst [vmem:[#allocation10] sm:$0xff] %v548_v35 }
 0x2b1   :  { %812 = shalt.err (!%p809_p10)
}
 0x2b2   :  { %563 = dma.vmem_to_hbm [thread:$0]  %s561_s16, 128, %s901_s5, [#allocation4]  }
 0x2b3   :  { %827 = dma.done.wait [#allocation4], 128  }
 0x2b4   :  { %828 = vsyncadd [#allocation4], 4294967168 }
 0x2b5   :  { %567 = vsyncpa [#allocation3], 1 }
 0x2b6   :  { %568 = vsyncpa [#allocation6], 1 }
 0x2b7   :  { %569 = vsyncpa [#allocation9], 1 }
 0x2b8   :  { %570 = vsyncpa [#allocation4], 1 }

</bundles_post_ra>
